<compile_context>
chip_gen: v7x
topology: tpu7x:2x2x1
jax: 0.10.0
libtpu: 0.0.40
codegen_flags: <defaults>
</compile_context>

<pallas_src>
from itertools import permutations

import jax
import jax.numpy as jnp
from jax.experimental import pallas as pl
from jax.experimental.pallas import tpu as pltpu

ROWS = 8                 # sublane dimension of every block
LANE = 128               # lane dimension granularity
BLOCK_COLS_DEFAULT = 2048  # lanes per grid step for large N (64 KiB f32 block)


def _linear_reduce_kernel(x_ref, w_ref, o_ref, acc_ref):
    """acc += x * w per block (VPU only); final step does one XLU reduce."""
    k = pl.program_id(0)

    @pl.when(k == 0)
    def _():
        acc_ref[...] = jnp.zeros_like(acc_ref)

    # Pure elementwise multiply-add on the VPU; no per-step cross-lane reduce.
    acc_ref[...] = acc_ref[...] + x_ref[...] * w_ref[...]

    @pl.when(k == pl.num_programs(0) - 1)
    def _():
        o_ref[...] = jnp.sum(acc_ref[...], keepdims=True)


def _slab_layout(n, block_cols=BLOCK_COLS_DEFAULT):
    """Return (total_cols, block_cols) for an (ROWS, total_cols) padded slab."""
    min_cols = -(-n // ROWS)                       # cols needed to hold n elems
    cols_128 = -(-min_cols // LANE) * LANE         # round up to lane multiple
    bc = min(block_cols, cols_128)                 # single block for small N
    total_cols = -(-cols_128 // bc) * bc           # multiple of block width
    return total_cols, bc


def _pad_to_slab(vec, total_cols):
    """Pad a 1-D f32 vector with zeros and reshape to (ROWS, total_cols)."""
    n = vec.shape[0]
    n_pad = ROWS * total_cols
    return jnp.pad(vec.astype(jnp.float32), (0, n_pad - n)).reshape(ROWS, total_cols)


def pallas_dot_1out(x_slab, w_slab, block_cols):
    """sum(x_slab * w_slab) via a tiled Pallas reduction. Returns shape (1,)."""
    total_cols = x_slab.shape[1]
    grid = (total_cols // block_cols,)
    out = pl.pallas_call(
        _linear_reduce_kernel,
        out_shape=jax.ShapeDtypeStruct((1, 1), jnp.float32),
        grid_spec=pltpu.PrefetchScalarGridSpec(
            num_scalar_prefetch=0,
            grid=grid,
            in_specs=[
                pl.BlockSpec((ROWS, block_cols), lambda k: (0, k)),
                pl.BlockSpec((ROWS, block_cols), lambda k: (0, k)),
            ],
            out_specs=pl.BlockSpec((1, 1), lambda k: (0, 0)),
            scratch_shapes=[pltpu.VMEM((ROWS, block_cols), jnp.float32)],
        ),
        compiler_params=pltpu.CompilerParams(
            dimension_semantics=("arbitrary",),  # reduction axis
        ),
    )(x_slab, w_slab)
    return out.reshape(1)


def concat_strategy_forward(comp, parts, weight, bias):
    """Pure-JAX glue reproducing ConcatStrategy.forward, Pallas for the Linear."""
    comp_f = comp.reshape(-1).astype(jnp.float32)
    parts_f = [p.reshape(-1).astype(jnp.float32) for p in parts]
    parts_size = sum(p.shape[0] for p in parts_f)

    # Permutation-invariant sum of concatenations (cheap for small P).
    # TODO(synk): for P >= 4 parts fold this into a weight-side precompute to
    # avoid P! concatenations (mathematically identical).
    parts_cat = jnp.zeros((parts_size,), jnp.float32)
    for idxs in permutations(range(len(parts_f)), len(parts_f)):
        parts_cat = parts_cat + jnp.concatenate([parts_f[i] for i in idxs])

    full_embedded = jnp.concatenate([comp_f, parts_cat])
    n = full_embedded.shape[0]

    total_cols, bc = _slab_layout(n)
    x_slab = _pad_to_slab(full_embedded, total_cols)
    # In a real module the padded weight slab would be cached across calls
    # (it is a fixed parameter); computed inline here for a self-contained demo.
    w_slab = _pad_to_slab(weight.reshape(-1), total_cols)

    y = pallas_dot_1out(x_slab, w_slab, bc)
    return y + bias.reshape(1).astype(jnp.float32)   # bias added in the wrapper


if __name__ == "__main__":
    key = jax.random.PRNGKey(0)
    k_comp, k_p1, k_p2, k_w, k_b = jax.random.split(key, 5)

    # Small shapes: comp (4, 16) -> 64 feats; parts (2, 16) and (3, 16) -> 32 + 48.
    comp = jax.random.normal(k_comp, (4, 16), jnp.float32)
    part1 = jax.random.normal(k_p1, (2, 16), jnp.float32)
    part2 = jax.random.normal(k_p2, (3, 16), jnp.float32)
    parts = (part1, part2)

    input_size = comp.size + part1.size + part2.size  # 144

    # Deterministic Linear(input_size, 1) init, PyTorch-style uniform(-1/sqrt(in), 1/sqrt(in)).
    bound = 1.0 / (input_size ** 0.5)
    weight = jax.random.uniform(k_w, (1, input_size), jnp.float32, -bound, bound)
    bias = jax.random.uniform(k_b, (1,), jnp.float32, -bound, bound)

    out = concat_strategy_forward(comp, parts, weight, bias)
    out = jax.block_until_ready(out)

    # Pure-JAX reference check of the full forward.
    comp_f = comp.reshape(-1)
    pf = [p.reshape(-1) for p in parts]
    parts_cat = jnp.zeros((sum(p.shape[0] for p in pf),), jnp.float32)
    for idxs in permutations(range(len(pf)), len(pf)):
        parts_cat = parts_cat + jnp.concatenate([pf[i] for i in idxs])
    ref = weight @ jnp.concatenate([comp_f, parts_cat]) + bias
    assert out.shape == (1,)
    assert jnp.allclose(out, ref, atol=1e-5, rtol=1e-5)

    print("KERNEL_OK")
</pallas_src>

<mosaic_0001>
module attributes {stable_mosaic.version = 11 : i64} {
  func.func @_linear_reduce_kernel(%arg0: i32, %arg1: memref<8x128xf32, #tpu.memory_space<vmem>>, %arg2: memref<8x128xf32, #tpu.memory_space<vmem>>, %arg3: memref<1x1xf32, #tpu.memory_space<vmem>>, %arg4: memref<8x128xf32, #tpu.memory_space<vmem>>) attributes {dimension_semantics = [#tpu.dimension_semantics<arbitrary>], iteration_bounds = array<i64: 1>, scalar_prefetch = 0 : i64, scratch_operands = 1 : i64, tpu.core_type = #tpu.core_type<tc>, window_params = [{transform_indices = @transform_0, window_bounds = array<i64: 8, 128>}, {transform_indices = @transform_1, window_bounds = array<i64: 8, 128>}, {pipeline_mode = #tpu.pipeline_mode<synchronous>, transform_indices = @transform_2, window_bounds = array<i64: 1, 1>}]} {
    %c0_i32 = arith.constant 0 : i32
    %0 = arith.cmpi eq, %arg0, %c0_i32 : i32
    %1 = arith.extui %0 : i1 to i32
    %c0_i32_0 = arith.constant 0 : i32
    %2 = arith.cmpi ne, %1, %c0_i32_0 : i32
    scf.if %2 {
      %cst = arith.constant 0.000000e+00 : f32
      %12 = vector.broadcast %cst : f32 to vector<8x128xf32>
      %c0_10 = arith.constant 0 : index
      %c0_11 = arith.constant 0 : index
      %13 = vector.load %arg4[%c0_10, %c0_11] : memref<8x128xf32, #tpu.memory_space<vmem>>, vector<8x128xf32>
      tpu.vector_store %arg4[%c0_10, %c0_11], %12 {strides = array<i32>} : memref<8x128xf32, #tpu.memory_space<vmem>>, vector<8x128xf32>,
    } else {
    }
    %c0 = arith.constant 0 : index
    %c0_1 = arith.constant 0 : index
    %3 = vector.load %arg4[%c0, %c0_1] : memref<8x128xf32, #tpu.memory_space<vmem>>, vector<8x128xf32>
    %c0_2 = arith.constant 0 : index
    %c0_3 = arith.constant 0 : index
    %4 = vector.load %arg1[%c0_2, %c0_3] : memref<8x128xf32, #tpu.memory_space<vmem>>, vector<8x128xf32>
    %c0_4 = arith.constant 0 : index
    %c0_5 = arith.constant 0 : index
    %5 = vector.load %arg2[%c0_4, %c0_5] : memref<8x128xf32, #tpu.memory_space<vmem>>, vector<8x128xf32>
    %6 = arith.mulf %4, %5 : vector<8x128xf32>
    %7 = arith.addf %3, %6 : vector<8x128xf32>
    %c0_6 = arith.constant 0 : index
    %c0_7 = arith.constant 0 : index
    %8 = vector.load %arg4[%c0_6, %c0_7] : memref<8x128xf32, #tpu.memory_space<vmem>>, vector<8x128xf32>
    tpu.vector_store %arg4[%c0_6, %c0_7], %7 {strides = array<i32>} : memref<8x128xf32, #tpu.memory_space<vmem>>, vector<8x128xf32>,
    %c0_i32_8 = arith.constant 0 : i32
    %9 = arith.cmpi eq, %arg0, %c0_i32_8 : i32
    %10 = arith.extui %9 : i1 to i32
    %c0_i32_9 = arith.constant 0 : i32
    %11 = arith.cmpi ne, %10, %c0_i32_9 : i32
    scf.if %11 {
      %c0_10 = arith.constant 0 : index
      %c0_11 = arith.constant 0 : index
      %12 = vector.load %arg4[%c0_10, %c0_11] : memref<8x128xf32, #tpu.memory_space<vmem>>, vector<8x128xf32>
      %13 = vector.shape_cast %12 : vector<8x128xf32> to vector<1x8x128xf32>
      %cst = arith.constant dense<0.000000e+00> : vector<1xf32>
      %14 = vector.multi_reduction <add>, %13, %cst [1, 2] : vector<1x8x128xf32> to vector<1xf32>
      %15 = vector.shape_cast %14 : vector<1xf32> to vector<1x1x1xf32>
      %16 = vector.extract %15[0, 0, 0] : f32 from vector<1x1x1xf32>
      %17 = vector.broadcast %16 : f32 to vector<1x1xf32>
      %c0_12 = arith.constant 0 : index
      %c0_13 = arith.constant 0 : index
      %18 = vector.load %arg3[%c0_12, %c0_13] : memref<1x1xf32, #tpu.memory_space<vmem>>, vector<1x1xf32>
      tpu.vector_store %arg3[%c0_12, %c0_13], %17 {strides = array<i32>} : memref<1x1xf32, #tpu.memory_space<vmem>>, vector<1x1xf32>,
    } else {
    }
    return
  }
  func.func @transform_0(%arg0: i32) -> (i32, i32) {
    %c0_i32 = arith.constant 0 : i32
    %c0_i32_0 = arith.constant 0 : i32
    return %c0_i32, %arg0 : i32, i32
  }
  func.func @transform_1(%arg0: i32) -> (i32, i32) {
    %c0_i32 = arith.constant 0 : i32
    %c0_i32_0 = arith.constant 0 : i32
    return %c0_i32, %arg0 : i32, i32
  }
  func.func @transform_2(%arg0: i32) -> (i32, i32) {
    %c0_i32 = arith.constant 0 : i32
    %c0_i32_0 = arith.constant 0 : i32
    %c0_i32_1 = arith.constant 0 : i32
    return %c0_i32, %c0_i32_0 : i32, i32
  }
}

</mosaic_0001>

<bundles_post_ra>
// kernel: tpu_custom_call.1
= control target key start
LH: loop header
LB: loop body
LE: loop exit
PB: predicated region body
PF: predicated region fallthrough
CT: control target
= control target key end

     0   :  { %7 = vsyncpa [#allocation4], 0  ;;  %s210_s0 = inlined_call_operand.hbm [shape: f32[8,128], index: 0, kind: input, shape index: {}]   ;;  %s211_s1 = inlined_call_operand.hbm [shape: f32[8,128], index: 1, kind: input, shape index: {}]   ;;  %s212_s2 = inlined_call_operand.hbm [shape: f32[1,1], index: 2, kind: output, shape index: {}]  }
   0x1   :  { %8 = vsyncpa [#allocation7], 0 }
   0x2   :  { %9 = vsyncpa [#allocation5], 0  ;;  %s156_s9 = smov [#allocation3]   ;;  %s157_s11 = smov [#allocation6]  }
   0x3   :  { %s16_s10 = sshll.u32 %s156_s9, 4  ;;  %s26_s12 = sshll.u32 %s157_s11, 4  ;;  %s17_s10 = int_to_ptr.vmem [resolvable:$true] %s16_s10  ;;  %s27_s12 = int_to_ptr.vmem [resolvable:$true] %s26_s12 }
   0x4   :  { %s84_s15 = scalar_lea.hbm %s210_s0, 128 }
   0x5   :  { %p85_p0 = scmp.ne.s32.totalorder %s210_s0, %s84_s15  ;;  %p88_p1 = scmp.lt.u32.totalorder %s84_s15, %s210_s0 }
   0x7   :  { %p90_p2 = pnand %p88_p1, %p85_p0 }
   0x9   :  { %93 = shalt.err (!%p90_p2)
}
   0xa   :  { %s94_s20 = scalar_lea.vmem %s17_s10, 128  ;;  %p99_p4 = scmp.lt.s32.totalorder %s17_s10, %s17_s10 }
   0xb   :  { %p95_p3 = scmp.ne.s32.totalorder %s17_s10, %s94_s20  ;;  %p100_p5 = scmp.lt.s32.totalorder %s94_s20, %s94_s20 }
   0xd   :  { %p101_p6 = por %p100_p5, %p99_p4 }
   0xf   :  { %p102_p7 = pnand %p101_p6, %p95_p3 }
  0x11   :  { %105 = shalt.err (!%p102_p7)
}
  0x12   :  { %19 = dma.hbm_to_vmem [thread:$0]  %s210_s0, 128, %s17_s10, [#allocation4]  }
  0x13   :  { %s106_s25 = scalar_lea.hbm %s211_s1, 128 }
  0x14   :  { %p107_p8 = scmp.ne.s32.totalorder %s211_s1, %s106_s25  ;;  %p110_p9 = scmp.lt.u32.totalorder %s106_s25, %s211_s1 }
  0x16   :  { %p112_p10 = pnand %p110_p9, %p107_p8 }
  0x18   :  { %115 = shalt.err (!%p112_p10)
}
  0x19   :  { %s116_s30 = scalar_lea.vmem %s27_s12, 128  ;;  %p121_p12 = scmp.lt.s32.totalorder %s27_s12, %s27_s12 }
  0x1a   :  { %p117_p11 = scmp.ne.s32.totalorder %s27_s12, %s116_s30  ;;  %p122_p13 = scmp.lt.s32.totalorder %s116_s30, %s116_s30 }
  0x1c   :  { %p123_p0 = por %p122_p13, %p121_p12 }
  0x1e   :  { %p124_p1 = pnand %p123_p0, %p117_p11 }
  0x20   :  { %127 = shalt.err (!%p124_p1)
}
  0x21   :  { %29 = dma.hbm_to_vmem [thread:$0]  %s211_s1, 128, %s27_s12, [#allocation7]  }
  0x22   :  { %150 = dma.done.wait [#allocation4], 128  }
  0x23   :  { %151 = vsyncadd [#allocation4], 4294967168 }
  0x24   :  { %152 = dma.done.wait [#allocation7], 128  }
  0x25   :  { %153 = vsyncadd [#allocation7], 4294967168  ;;  %v42_v0 = vld [vmem:[#allocation3] sm:$0xff]  ;;  %v43_v1 = vld [vmem:[#allocation6] sm:$0xff]  ;;  %s158_s4 = smov [#allocation8]   ;;  %vm61_vm0 = vcmask 0  }
  0x26   :  { %v44_v2 = vmul.f32 %v43_v1, %v42_v0  ;;  %s69_s5 = sshll.u32 %s158_s4, 4  ;;  %s70_s5 = int_to_ptr.vmem [resolvable:$true] %s69_s5 }
  0x27   :  { %s128_s6 = scalar_lea.vmem %s70_s5, 16  ;;  %s132_s7 = scalar_lea.vmem %s70_s5, 32 }
  0x28   :  { %51 = vadd.xlane.f32.xlu0 %v44_v2  ;;  %p129_p2 = scmp.ne.s32.totalorder %s70_s5, %s128_s6  ;;  %p133_p3 = scmp.lt.s32.totalorder %s70_s5, %s70_s5 }
  0x29   :  { %p134_p4 = scmp.lt.s32.totalorder %s132_s7, %s128_s6 }
  0x2b   :  { %p135_p5 = por %p134_p4, %p133_p3 }
  0x2d   :  { %p136_p6 = pnand %p135_p5, %p129_p2 }
  0xb5   :  { %v52_v3 = vpop.xlane.xlu0 %51 }
  0xb6   :  { %v53_v4 = vrot.slane %v52_v3, 4 }
  0xb8   :  { %v54_v5 = vadd.f32 %v53_v4, %v52_v3 }
  0xba   :  { %v55_v6 = vrot.slane %v54_v5, 2 }
  0xbc   :  { %v56_v7 = vadd.f32 %v55_v6, %v54_v5 }
  0xbe   :  { %v57_v8 = vrot.slane %v56_v7, 1 }
  0xc0   :  { %v58_v9 = vadd.f32 %v57_v8, %v56_v7 }
  0xc2   :  { %79 = vpush %v58_v9 }
  0xf3   :  { %s80_s1 = spop %79 }
  0xf4   :  { %v60_v10 = vstv %s80_s1 }
  0xf5   :  { %62 = vst.msk [vmem:[#allocation8] sm:$0x1] %vm61_vm0, %v60_v10 }
  0xf6   :  { %139 = shalt.err (!%p136_p6)
}
  0xf7   :  { %s140_s10 = scalar_lea.hbm %s212_s2, 16 }
  0xf8   :  { %p141_p7 = scmp.ne.s32.totalorder %s212_s2, %s140_s10  ;;  %p144_p8 = scmp.lt.u32.totalorder %s140_s10, %s212_s2 }
  0xfa   :  { %p146_p9 = pnand %p144_p8, %p141_p7 }
  0xfc   :  { %149 = shalt.err (!%p146_p9)
}
  0xfd   :  { %72 = dma.vmem_to_hbm [thread:$0]  %s70_s5, 16, %s212_s2, [#allocation5]  }
  0xfe   :  { %154 = dma.done.wait [#allocation5], 16  }
  0xff   :  { %155 = vsyncadd [#allocation5], 4294967280 }
 0x100   :  { %76 = vsyncpa [#allocation4], 1 }
 0x101   :  { %77 = vsyncpa [#allocation7], 1 }
 0x102   :  { %78 = vsyncpa [#allocation5], 1 }

</bundles_post_ra>
